<compile_context>
chip_gen: v7x
topology: tpu7x:2x2x1
jax: 0.10.0
libtpu: 0.0.40
codegen_flags: <defaults>
</compile_context>

<pallas_src>
import math

import jax
import jax.numpy as jnp
from jax import lax
from jax.experimental import pallas as pl
from jax.experimental.pallas import tpu as pltpu


def _round_up(x, m):
    return ((x + m - 1) // m) * m


def _sublane_align(dtype):
    """Minimum sublane multiple for this dtype: 8 (f32), 16 (bf16/f16), 32 (int8/fp8)."""
    bits = jnp.dtype(dtype).itemsize * 8
    return max(8, 256 // bits)


def _largest_aligned_divisor(dim, target, align=128):
    """Largest multiple of `align` that divides `dim` (a multiple of `align`) and is
    <= max(target, align)."""
    best = align
    d = align
    limit = min(dim, max(target, align))
    while d <= limit:
        if dim % d == 0:
            best = d
        d += align
    return best


def _vmem_capacity_bytes():
    """Per-core VMEM capacity; conservative 64 MiB fallback (v7x-sized) if unknown."""
    try:
        info = pltpu.get_tpu_info()
        for attr in ("vmem_capacity_bytes", "vmem_bytes", "vmem_size_bytes"):
            v = getattr(info, attr, None)
            if v is not None:
                v = int(v)
                if v > 0:
                    return v
    except Exception:
        pass
    return 64 * 1024 * 1024


def _kernel_acc(x_ref, w_ref, b_ref, o_ref, acc_ref):
    """o = x @ w.T + b via an f32 scratch accumulator (non-f32 output dtype).
    Bias is folded into the k==0 init; last k is a pure cast/store."""
    k = pl.program_id(2)

    @pl.when(k == 0)
    def _():
        acc_ref[...] = jnp.broadcast_to(
            b_ref[...].astype(jnp.float32), acc_ref.shape)

    acc_ref[...] += lax.dot_general(
        x_ref[...], w_ref[...],
        dimension_numbers=(((1,), (1,)), ((), ())),  # contract K with K (w is (tn, tk))
        preferred_element_type=jnp.float32,
    )

    @pl.when(k == pl.num_programs(2) - 1)
    def _():
        o_ref[...] = acc_ref[...].astype(o_ref.dtype)


def _kernel_f32(x_ref, w_ref, b_ref, o_ref):
    """o = x @ w.T + b accumulating directly into the resident f32 output block.
    Bias is folded into the k==0 init; no epilogue pass needed."""
    k = pl.program_id(2)

    @pl.when(k == 0)
    def _():
        o_ref[...] = jnp.broadcast_to(
            b_ref[...].astype(jnp.float32), o_ref.shape)

    o_ref[...] += lax.dot_general(
        x_ref[...], w_ref[...],
        dimension_numbers=(((1,), (1,)), ((), ())),
        preferred_element_type=jnp.float32,
    )


def generator_forward(x, weight, bias, *, tm=None, tn=None, tk=None,
                      out_dtype=None, interpret=False):
    """y = x @ weight.T + bias, matching nn.Linear / Generator semantics.

    x:      (..., d_model)
    weight: (vocab, d_model)  -- native PyTorch layout, never transposed/copied here
    bias:   (vocab,)
    returns (..., vocab) in `out_dtype` (default: x.dtype)
    """
    *lead, d_model = x.shape
    vocab, d_model_w = weight.shape
    assert d_model == d_model_w, "weight/input d_model mismatch"
    assert bias.shape == (vocab,)

    out_dtype = jnp.dtype(x.dtype if out_dtype is None else out_dtype)
    use_scratch = out_dtype != jnp.dtype(jnp.float32)

    M = math.prod(lead) if lead else 1
    K, N = d_model, vocab

    x2d = x.reshape(M, K)
    b2d = bias.reshape(1, N)

    # --- contracted dim K must tile exactly; zero-pad only if d_model % 128 != 0 ---
    K_pad = K if K % 128 == 0 else _round_up(K, 128)
    if K_pad != K:
        x2d = jnp.pad(x2d, ((0, 0), (0, K_pad - K)))
        w2d = jnp.pad(weight, ((0, 0), (0, K_pad - K)))
    else:
        w2d = weight  # native (N, K) layout; no padded copy, no transpose

    # --- generation-aware tile targets and VMEM budget ---
    vmem_cap = _vmem_capacity_bytes()
    big_vmem = vmem_cap >= 100 * 1024 * 1024          # v5e / v6e (128 MiB parts)
    budget = int(vmem_cap * (0.85 if big_vmem else 0.80))

    m_align = _sublane_align(x.dtype)
    M_r = _round_up(M, m_align)

    tm_t = tm if tm is not None else (1024 if big_vmem else 768)
    tn_t = tn if tn is not None else (1024 if big_vmem else 768)
    tk_t = tk if tk is not None else 2048
    if tn is None and M_r <= 256:
        # decode / small-M: weight-HBM-bound -> bigger weight tiles, not deeper buffers
        tn_t = min(2 * tn_t, 2048)

    tm_v = max(m_align, min(tm_t, M_r))
    tn_v = max(128, min(_round_up(tn_t, 128), _round_up(N, 128)))
    tk_v = _largest_aligned_divisor(K_pad, tk_t)

    x_b = jnp.dtype(x2d.dtype).itemsize
    w_b = jnp.dtype(w2d.dtype).itemsize
    b_b = jnp.dtype(b2d.dtype).itemsize
    o_b = out_dtype.itemsize

    def _est(tm_, tn_, tk_):
        return (2 * tm_ * tk_ * x_b            # x tile (double-buffered)
                + 2 * tn_ * tk_ * w_b          # weight tile (double-buffered)
                + 2 * tn_ * b_b                # bias tile
                + 2 * tm_ * tn_ * o_b          # output tile
                + (tm_ * tn_ * 4 if use_scratch else 0))

    # shrink tiles until the working set fits this generation's VMEM budget
    while _est(tm_v, tn_v, tk_v) > budget:
        if tn_v > 512:
            tn_v = max(512, (tn_v // 2) // 128 * 128)
        elif tk_v > 256:
            tk_v = _largest_aligned_divisor(K_pad, tk_v // 2)
        elif tm_v > 256:
            tm_v = max(256, (tm_v // 2) // m_align * m_align)
        else:
            break

    # Ragged M / N boundary blocks are handled by Pallas (OOB reads are don't-care,
    # OOB writes are dropped) -> no padded weight copy, no output slice copy.
    grid = (pl.cdiv(M, tm_v), pl.cdiv(N, tn_v), K_pad // tk_v)
    gm, gn, _ = grid

    kernel = _kernel_acc if use_scratch else _kernel_f32
    scratch_shapes = [pltpu.VMEM((tm_v, tn_v), jnp.float32)] if use_scratch else []

    cost = pl.CostEstimate(
        flops=2 * (gm * tm_v) * (gn * tn_v) * K_pad,
        transcendentals=0,
        bytes_accessed=(gm * (gn * tn_v) * K_pad * w_b     # weight re-streamed per M-tile
                        + gn * (gm * tm_v) * K_pad * x_b   # x re-streamed per N-tile
                        + (gm * tm_v) * (gn * tn_v) * o_b
                        + (gn * tn_v) * b_b),
    )

    out = pl.pallas_call(
        kernel,
        out_shape=jax.ShapeDtypeStruct((M, N), out_dtype),
        grid_spec=pltpu.PrefetchScalarGridSpec(
            num_scalar_prefetch=0,
            grid=grid,
            in_specs=[
                pl.BlockSpec((tm_v, tk_v), lambda i, j, k: (i, k)),  # x tile (M, K)
                pl.BlockSpec((tn_v, tk_v), lambda i, j, k: (j, k)),  # W tile (N, K), native
                pl.BlockSpec((1, tn_v), lambda i, j, k: (0, j)),     # bias tile
            ],
            out_specs=pl.BlockSpec((tm_v, tn_v), lambda i, j, k: (i, j)),
            scratch_shapes=scratch_shapes,
        ),
        compiler_params=pltpu.CompilerParams(
            dimension_semantics=("parallel", "parallel", "arbitrary"),
            vmem_limit_bytes=budget,
        ),
        cost_estimate=cost,
        interpret=interpret,
    )(x2d, w2d, b2d)

    return out.reshape(*lead, N)


if __name__ == "__main__":
    key = jax.random.PRNGKey(0)
    kx, kw, kb = jax.random.split(key, 3)

    # --- test 1: small shapes, f32 (direct-output-accumulation, bias-folded init) ---
    batch, seq, d_model, vocab = 2, 8, 128, 256
    bound = 1.0 / math.sqrt(d_model)
    weight = jax.random.uniform(kw, (vocab, d_model), jnp.float32, -bound, bound)
    bias = jax.random.uniform(kb, (vocab,), jnp.float32, -bound, bound)
    x = jax.random.normal(kx, (batch, seq, d_model), jnp.float32)

    y = generator_forward(x, weight, bias)
    jax.block_until_ready(y)
    y_ref = x @ weight.T + bias
    assert y.shape == (batch, seq, vocab)
    assert jnp.allclose(y, y_ref, atol=1e-4, rtol=1e-4)

    # --- test 2: non-divisible shapes exercise ragged M/N blocks + K zero-pad path ---
    d2, v2 = 96, 200
    w2 = jax.random.uniform(kw, (v2, d2), jnp.float32, -0.1, 0.1)
    b2 = jax.random.uniform(kb, (v2,), jnp.float32, -0.1, 0.1)
    x2 = jax.random.normal(kx, (1, 5, d2), jnp.float32)
    y2 = generator_forward(x2, w2, b2)
    jax.block_until_ready(y2)
    y2_ref = x2 @ w2.T + b2
    assert y2.shape == (1, 5, v2)
    assert jnp.allclose(y2, y2_ref, atol=1e-4, rtol=1e-4)

    # --- test 3: bf16 inputs/outputs exercise the f32-scratch-accumulator path ---
    xb = x.astype(jnp.bfloat16)
    wb = weight.astype(jnp.bfloat16)
    bb = bias.astype(jnp.bfloat16)
    y3 = generator_forward(xb, wb, bb)
    jax.block_until_ready(y3)
    y3_ref = (xb.astype(jnp.float32) @ wb.astype(jnp.float32).T
              + bb.astype(jnp.float32)).astype(jnp.bfloat16)
    assert y3.dtype == jnp.bfloat16
    assert jnp.allclose(y3.astype(jnp.float32), y3_ref.astype(jnp.float32),
                        atol=2e-2, rtol=2e-2)

    print("KERNEL_OK")
</pallas_src>

<mosaic_0001>
module attributes {stable_mosaic.version = 11 : i64} {
  func.func @_kernel_f32(%arg0: i32, %arg1: i32, %arg2: i32, %arg3: memref<16x128xf32, #tpu.memory_space<vmem>>, %arg4: memref<256x128xf32, #tpu.memory_space<vmem>>, %arg5: memref<1x256xf32, #tpu.memory_space<vmem>>, %arg6: memref<16x256xf32, #tpu.memory_space<vmem>>) attributes {dimension_semantics = [#tpu.dimension_semantics<parallel>, #tpu.dimension_semantics<parallel>, #tpu.dimension_semantics<arbitrary>], iteration_bounds = array<i64: 1, 1, 1>, scalar_prefetch = 0 : i64, scratch_operands = 0 : i64, tpu.core_type = #tpu.core_type<tc>, window_params = [{transform_indices = @transform_0, window_bounds = array<i64: 16, 128>}, {transform_indices = @transform_1, window_bounds = array<i64: 256, 128>}, {transform_indices = @transform_2, window_bounds = array<i64: 1, 256>}, {transform_indices = @transform_3, window_bounds = array<i64: 16, 256>}]} {
    %c0_i32 = arith.constant 0 : i32
    %0 = arith.cmpi eq, %arg2, %c0_i32 : i32
    %1 = arith.extui %0 : i1 to i32
    %c0_i32_0 = arith.constant 0 : i32
    %2 = arith.cmpi ne, %1, %c0_i32_0 : i32
    scf.if %2 {
      %c0_8 = arith.constant 0 : index
      %c0_9 = arith.constant 0 : index
      %9 = vector.load %arg5[%c0_8, %c0_9] : memref<1x256xf32, #tpu.memory_space<vmem>>, vector<1x256xf32>
      %10 = vector.shape_cast %9 : vector<1x256xf32> to vector<1x256xf32>
      %11 = vector.broadcast %10 : vector<1x256xf32> to vector<16x256xf32>
      %c0_10 = arith.constant 0 : index
      %c0_11 = arith.constant 0 : index
      %12 = vector.load %arg6[%c0_10, %c0_11] : memref<16x256xf32, #tpu.memory_space<vmem>>, vector<16x256xf32>
      tpu.vector_store %arg6[%c0_10, %c0_11], %11 {strides = array<i32>} : memref<16x256xf32, #tpu.memory_space<vmem>>, vector<16x256xf32>,
    } else {
    }
    %c0 = arith.constant 0 : index
    %c0_1 = arith.constant 0 : index
    %3 = vector.load %arg6[%c0, %c0_1] : memref<16x256xf32, #tpu.memory_space<vmem>>, vector<16x256xf32>
    %c0_2 = arith.constant 0 : index
    %c0_3 = arith.constant 0 : index
    %4 = vector.load %arg3[%c0_2, %c0_3] : memref<16x128xf32, #tpu.memory_space<vmem>>, vector<16x128xf32>
    %c0_4 = arith.constant 0 : index
    %c0_5 = arith.constant 0 : index
    %5 = vector.load %arg4[%c0_4, %c0_5] : memref<256x128xf32, #tpu.memory_space<vmem>>, vector<256x128xf32>
    %cst = arith.constant dense<0.000000e+00> : vector<16x256xf32>
    %6 = tpu.matmul %4, %5, %cst {dimension_numbers = #tpu.dot_dimension_numbers<[1], [1], [0], [0], [0, 0, 1, 0], [], []>} : vector<16x128xf32>, vector<256x128xf32>, vector<16x256xf32> -> vector<16x256xf32>
    %7 = arith.addf %3, %6 : vector<16x256xf32>
    %c0_6 = arith.constant 0 : index
    %c0_7 = arith.constant 0 : index
    %8 = vector.load %arg6[%c0_6, %c0_7] : memref<16x256xf32, #tpu.memory_space<vmem>>, vector<16x256xf32>
    tpu.vector_store %arg6[%c0_6, %c0_7], %7 {strides = array<i32>} : memref<16x256xf32, #tpu.memory_space<vmem>>, vector<16x256xf32>,
    return
  }
  func.func @transform_0(%arg0: i32, %arg1: i32, %arg2: i32) -> (i32, i32) {
    %c0_i32 = arith.constant 0 : i32
    return %arg0, %arg2 : i32, i32
  }
  func.func @transform_1(%arg0: i32, %arg1: i32, %arg2: i32) -> (i32, i32) {
    %c0_i32 = arith.constant 0 : i32
    return %arg1, %arg2 : i32, i32
  }
  func.func @transform_2(%arg0: i32, %arg1: i32, %arg2: i32) -> (i32, i32) {
    %c0_i32 = arith.constant 0 : i32
    %c0_i32_0 = arith.constant 0 : i32
    return %c0_i32, %arg1 : i32, i32
  }
  func.func @transform_3(%arg0: i32, %arg1: i32, %arg2: i32) -> (i32, i32) {
    %c0_i32 = arith.constant 0 : i32
    return %arg0, %arg1 : i32, i32
  }
}

</mosaic_0001>

<bundles_post_ra>
// kernel: tpu_custom_call.1
= control target key start
LH: loop header
LB: loop body
LE: loop exit
PB: predicated region body
PF: predicated region fallthrough
CT: control target
= control target key end

     0   :  { %8 = vsyncpa [#allocation3], 0  ;;  %s433_s0 = inlined_call_operand.hbm [shape: f32[16,128], index: 0, kind: input, shape index: {}]   ;;  %s434_s1 = inlined_call_operand.hbm [shape: f32[256,128], index: 1, kind: input, shape index: {}]   ;;  %s435_s2 = inlined_call_operand.vmem [shape: f32[1,256], index: 2, kind: input, shape index: {}]   ;;  %s436_s3 = inlined_call_operand.hbm [shape: f32[16,256], index: 3, kind: output, shape index: {}]  }
   0x1   :  { %9 = vsyncpa [#allocation6], 0 }
   0x2   :  { %10 = vsyncpa [#allocation4], 0  ;;  %s367_s12 = smov [#allocation2]   ;;  %s295_s16 = scalar_lea.hbm %s433_s0, 256 }
   0x3   :  { %s16_s13 = sshll.u32 %s367_s12, 4  ;;  %p296_p0 = scmp.ne.s32.totalorder %s433_s0, %s295_s16  ;;  %s17_s13 = int_to_ptr.vmem [resolvable:$true] %s16_s13 }
   0x4   :  { %p299_p1 = scmp.lt.u32.totalorder %s295_s16, %s433_s0 }
   0x6   :  { %p301_p2 = pnand %p299_p1, %p296_p0 }
   0x8   :  { %304 = shalt.err (!%p301_p2)
}
   0x9   :  { %s305_s21 = scalar_lea.vmem %s17_s13, 256  ;;  %p310_p4 = scmp.lt.s32.totalorder %s17_s13, %s17_s13 }
   0xa   :  { %p306_p3 = scmp.ne.s32.totalorder %s17_s13, %s305_s21  ;;  %p311_p5 = scmp.lt.s32.totalorder %s305_s21, %s305_s21 }
   0xc   :  { %p312_p6 = por %p311_p5, %p310_p4 }
   0xe   :  { %p313_p7 = pnand %p312_p6, %p306_p3 }
  0x10   :  { %316 = shalt.err (!%p313_p7)
}
  0x11   :  { %s368_s22 = smov 128   ;;  %s369_s23 = smov 8  }
  0x12   :  { %22 = dma.hbm_to_vmem [thread:$0]  %s433_s0, 256, %s17_s13, [#allocation3], %s368_s22, %s368_s22, %s369_s23  }
  0x13   :  { %s370_s26 = smov [#allocation5]   ;;  %s317_s30 = scalar_lea.hbm %s434_s1, 4096 }
  0x14   :  { %s28_s27 = sshll.u32 %s370_s26, 4  ;;  %p318_p8 = scmp.ne.s32.totalorder %s434_s1, %s317_s30  ;;  %s29_s27 = int_to_ptr.vmem [resolvable:$true] %s28_s27 }
  0x15   :  { %p321_p9 = scmp.lt.u32.totalorder %s317_s30, %s434_s1 }
  0x17   :  { %p323_p10 = pnand %p321_p9, %p318_p8 }
  0x19   :  { %326 = shalt.err (!%p323_p10)
}
  0x1a   :  { %s327_s8 = scalar_lea.vmem %s29_s27, 4096  ;;  %p332_p12 = scmp.lt.s32.totalorder %s29_s27, %s29_s27 }
  0x1b   :  { %p328_p11 = scmp.ne.s32.totalorder %s29_s27, %s327_s8  ;;  %p333_p13 = scmp.lt.s32.totalorder %s327_s8, %s327_s8 }
  0x1d   :  { %p334_p0 = por %p333_p13, %p332_p12 }
  0x1f   :  { %p335_p1 = pnand %p334_p0, %p328_p11 }
  0x21   :  { %338 = shalt.err (!%p335_p1)
}
  0x22   :  { %34 = dma.hbm_to_vmem [thread:$0]  %s434_s1, 4096, %s29_s27, [#allocation6], %s368_s22, %s368_s22, %s369_s23  }
  0x23   :  { %361 = dma.done.wait [#allocation3], 256  }
  0x24   :  { %362 = vsyncadd [#allocation3], 4294967040 }
  0x25   :  { %363 = dma.done.wait [#allocation6], 4096  }
  0x26   :  { %364 = vsyncadd [#allocation6], 4294963200  ;;  %v85_v0 = vld [vmem:[#allocation5 + $0x80] sm:$0xff]  ;;  %v86_v1 = vld [vmem:[#allocation5 + $0x88] sm:$0xff]  ;;  %v49_v50 = vlaneseq  ;;  %s371_s11 = smov [#allocation7]  }
  0x27   :  { %v69_v2 = vld [vmem:[#allocation5] sm:$0xff]  ;;  %v240_v3 = vpack.c.bf16 %v86_v1, %v85_v0  ;;  %v70_v4 = vld [vmem:[#allocation5 + $0x8] sm:$0xff]  ;;  %v87_v5 = vld [vmem:[#allocation5 + $0x90] sm:$0xff]  ;;  %s191_s12 = sshll.u32 %s371_s11, 4  ;;  %s192_s12 = int_to_ptr.vmem [resolvable:$true] %s191_s12 }
  0x28   :  { %v88_v6 = vld [vmem:[#allocation5 + $0x98] sm:$0xff]  ;;  %v242_v7 = vpack.c.bf16 %v70_v4, %v69_v2  ;;  %v71_v9 = vld [vmem:[#allocation5 + $0x10] sm:$0xff]  ;;  %v89_v11 = vld [vmem:[#allocation5 + $0xa0] sm:$0xff]  ;;  %v50_v51 = vshrl.u32 %v49_v50, 7  ;;  %s339_s13 = scalar_lea.vmem %s192_s12, 512  ;;  %p344_p3 = scmp.lt.s32.totalorder %s192_s12, %s192_s12 }
  0x29   :  { %v244_v8 = vpack.c.bf16 %v88_v6, %v87_v5  ;;  %241 = vmatprep.subr.bf16.mxu0 %v240_v3  ;;  %272 = vmatprep.subr.bf16.mxu1 %v240_v3  ;;  %v72_v10 = vld [vmem:[#allocation5 + $0x18] sm:$0xff]  ;;  %v90_v12 = vld [vmem:[#allocation5 + $0xa8] sm:$0xff]  ;;  %v67_v15 = vld [vmem:[#allocation2] sm:$0xff]  ;;  %p340_p2 = scmp.ne.s32.totalorder %s192_s12, %s339_s13  ;;  %p345_p4 = scmp.lt.s32.totalorder %s339_s13, %s339_s13 }
  0x2a   :  { %243 = vmatpush3.bf16.xpose.msra.mxu0 %v242_v7  ;;  %280 = vmatpush3.bf16.xpose.msra.mxu1 %v242_v7  ;;  %v246_v13 = vpack.c.bf16 %v72_v10, %v71_v9  ;;  %v248_v14 = vpack.c.bf16 %v90_v12, %v89_v11  ;;  %v68_v16 = vld [vmem:[#allocation2 + $0x8] sm:$0xff]  ;;  %v73_v17 = vld [vmem:[#allocation5 + $0x20] sm:$0xff]  ;;  %v74_v18 = vld [vmem:[#allocation5 + $0x28] sm:$0xff]  ;;  %v51_v52 = vsub.s32 0, %v50_v51  ;;  %v55_v54 = vsub.s32 1, %v50_v51 }
  0x2b   :  { %245 = vmatprep.subr.bf16.mxu0 %v244_v8  ;;  %273 = vmatprep.subr.bf16.mxu1 %v244_v8  ;;  %v91_v19 = vld [vmem:[#allocation5 + $0xb0] sm:$0xff]  ;;  %v92_v20 = vld [vmem:[#allocation5 + $0xb8] sm:$0xff]  ;;  %v250_v21 = vpack.c.bf16 %v74_v18, %v73_v17  ;;  %v93_v25 = vld [vmem:[#allocation5 + $0xc0] sm:$0xff]  ;;  %p346_p5 = por %p345_p4, %p344_p3 }
  0x2c   :  { %236 = vmatprep.mubr.f32.mxu0 %v67_v15  ;;  %238 = vmatprep.mubr.f32.mxu1 %v68_v16  ;;  %v252_v22 = vpack.c.bf16 %v92_v20, %v91_v19  ;;  %v75_v23 = vld [vmem:[#allocation5 + $0x30] sm:$0xff]  ;;  %v76_v24 = vld [vmem:[#allocation5 + $0x38] sm:$0xff]  ;;  %v94_v26 = vld [vmem:[#allocation5 + $0xc8] sm:$0xff] }
  0x2d   :  { %v254_v27 = vpack.c.bf16 %v76_v24, %v75_v23  ;;  %v256_v28 = vpack.c.bf16 %v94_v26, %v93_v25  ;;  %v77_v29 = vld [vmem:[#allocation5 + $0x40] sm:$0xff]  ;;  %v78_v30 = vld [vmem:[#allocation5 + $0x48] sm:$0xff]  ;;  %v95_v31 = vld [vmem:[#allocation5 + $0xd0] sm:$0xff]  ;;  %p347_p6 = pnand %p346_p5, %p340_p2 }
  0x2e   :  { %v96_v32 = vld [vmem:[#allocation5 + $0xd8] sm:$0xff]  ;;  %v258_v33 = vpack.c.bf16 %v78_v30, %v77_v29  ;;  %v79_v35 = vld [vmem:[#allocation5 + $0x50] sm:$0xff]  ;;  %v97_v37 = vld [vmem:[#allocation5 + $0xe0] sm:$0xff] }
  0x2f   :  { %v260_v34 = vpack.c.bf16 %v96_v32, %v95_v31  ;;  %v80_v36 = vld [vmem:[#allocation5 + $0x58] sm:$0xff]  ;;  %v98_v38 = vld [vmem:[#allocation5 + $0xe8] sm:$0xff]  ;;  %v81_v41 = vld [vmem:[#allocation5 + $0x60] sm:$0xff] }
  0x30   :  { %v262_v39 = vpack.c.bf16 %v80_v36, %v79_v35  ;;  %v264_v40 = vpack.c.bf16 %v98_v38, %v97_v37  ;;  %v82_v42 = vld [vmem:[#allocation5 + $0x68] sm:$0xff]  ;;  %v99_v43 = vld [vmem:[#allocation5 + $0xf0] sm:$0xff]  ;;  %v100_v44 = vld [vmem:[#allocation5 + $0xf8] sm:$0xff] }
  0x31   :  { %v266_v45 = vpack.c.bf16 %v82_v42, %v81_v41  ;;  %v268_v46 = vpack.c.bf16 %v100_v44, %v99_v43  ;;  %v83_v47 = vld [vmem:[#allocation5 + $0x70] sm:$0xff]  ;;  %v84_v48 = vld [vmem:[#allocation5 + $0x78] sm:$0xff] }
  0x32   :  { %247 = vmatpush3.bf16.xpose.msra.mxu0 %v246_v13  ;;  %281 = vmatpush3.bf16.xpose.msra.mxu1 %v246_v13  ;;  %v270_v49 = vpack.c.bf16 %v84_v48, %v83_v47  ;;  %v47_v53 = vld [vmem:[%s435_s2] sm:$0x3] }
  0x33   :  { %249 = vmatprep.subr.bf16.mxu0 %v248_v14  ;;  %274 = vmatprep.subr.bf16.mxu1 %v248_v14  ;;  %v52_v55 = vrot.slane %v47_v53, %v51_v52  ;;  %v56_v56 = vrot.slane %v47_v53, %v55_v54 }
  0x3a   :  { %251 = vmatpush3.bf16.xpose.msra.mxu0 %v250_v21  ;;  %282 = vmatpush3.bf16.xpose.msra.mxu1 %v250_v21 }
  0x3b   :  { %253 = vmatprep.subr.bf16.mxu0 %v252_v22  ;;  %275 = vmatprep.subr.bf16.mxu1 %v252_v22 }
  0x42   :  { %255 = vmatpush3.bf16.xpose.msra.mxu0 %v254_v27  ;;  %283 = vmatpush3.bf16.xpose.msra.mxu1 %v254_v27 }
  0x43   :  { %257 = vmatprep.subr.bf16.mxu0 %v256_v28  ;;  %276 = vmatprep.subr.bf16.mxu1 %v256_v28 }
  0x4a   :  { %259 = vmatpush3.bf16.xpose.msra.mxu0 %v258_v33  ;;  %284 = vmatpush3.bf16.xpose.msra.mxu1 %v258_v33 }
  0x4b   :  { %261 = vmatprep.subr.bf16.mxu0 %v260_v34  ;;  %277 = vmatprep.subr.bf16.mxu1 %v260_v34 }
  0x52   :  { %263 = vmatpush3.bf16.xpose.msra.mxu0 %v262_v39  ;;  %285 = vmatpush3.bf16.xpose.msra.mxu1 %v262_v39 }
  0x53   :  { %265 = vmatprep.subr.bf16.mxu0 %v264_v40  ;;  %278 = vmatprep.subr.bf16.mxu1 %v264_v40 }
  0x5a   :  { %267 = vmatpush3.bf16.xpose.msra.mxu0 %v266_v45  ;;  %286 = vmatpush3.bf16.xpose.msra.mxu1 %v266_v45 }
  0x5b   :  { %269 = vmatprep.subr.bf16.mxu0 %v268_v46  ;;  %279 = vmatprep.subr.bf16.mxu1 %v268_v46 }
  0x62   :  { %271 = vmatpush3.bf16.xpose.msra.mxu0 %v270_v49  ;;  %287 = vmatpush3.bf16.xpose.msra.mxu1 %v270_v49 }
  0x69   :  { %237 = vmatmul.mubr.f32.vlgmr.msra.gmra.mrb[0].mxu0 %v67_v15  ;;  %239 = vmatmul.mubr.f32.vlgmr.msra.gmra.mrb[0].mxu1 %v68_v16 }
 0x13c   :  { %v167_v57 = vpop.f32.mrb[0].mxu0  ;;  %v173_v58 = vpop.f32.mrb[0].mxu1 }
 0x13d   :  { %v178_v59 = vadd.f32 %v167_v57, %v52_v55  ;;  %v180_v60 = vadd.f32 %v173_v58, %v52_v55  ;;  %v169_v61 = vpop.f32.mrb[1].mxu0  ;;  %v175_v62 = vpop.f32.mrb[1].mxu1 }
 0x13e   :  { %v179_v63 = vadd.f32 %v169_v61, %v56_v56  ;;  %v181_v0 = vadd.f32 %v175_v62, %v56_v56 }
 0x13f   :  { %182 = vst [vmem:[#allocation7] sm:$0xff] %v178_v59  ;;  %184 = vst [vmem:[#allocation7 + $0x10] sm:$0xff] %v180_v60 }
 0x140   :  { %183 = vst [vmem:[#allocation7 + $0x8] sm:$0xff] %v179_v63  ;;  %185 = vst [vmem:[#allocation7 + $0x18] sm:$0xff] %v181_v0 }
 0x141   :  { %350 = shalt.err (!%p347_p6)
}
 0x142   :  { %s351_s15 = scalar_lea.hbm %s436_s3, 512 }
 0x143   :  { %p352_p7 = scmp.ne.s32.totalorder %s436_s3, %s351_s15  ;;  %p355_p8 = scmp.lt.u32.totalorder %s351_s15, %s436_s3 }
 0x145   :  { %p357_p9 = pnand %p355_p8, %p352_p7 }
 0x147   :  { %360 = shalt.err (!%p357_p9)
}
 0x148   :  { %s372_s20 = smov 256   ;;  %s373_s21 = smov 16  }
 0x149   :  { %197 = dma.vmem_to_hbm [thread:$0]  %s192_s12, 512, %s436_s3, [#allocation4], %s372_s20, %s372_s20, %s373_s21  }
 0x14a   :  { %365 = dma.done.wait [#allocation4], 512  }
 0x14b   :  { %366 = vsyncadd [#allocation4], 4294966784 }
 0x14c   :  { %201 = vsyncpa [#allocation3], 1 }
 0x14d   :  { %202 = vsyncpa [#allocation6], 1 }
 0x14e   :  { %203 = vsyncpa [#allocation4], 1 }

</bundles_post_ra>
